<compile_context>
chip_gen: v7x
topology: tpu7x:2x2x1
jax: 0.10.0
libtpu: 0.0.40
codegen_flags: <defaults>
</compile_context>

<pallas_src>
import jax
import jax.numpy as jnp
from jax import lax
from jax.experimental import pallas as pl
from jax.experimental.pallas import tpu as pltpu


# ----------------------------------------------------------------------------
# kernel
# ----------------------------------------------------------------------------
def _make_basic_block_kernel(H, has_downsample):
    """Kernel over one batch-block of images packed as (b_blk*H, W*C) rows.

    x_ref   : (M, W*Cin)        M = b_blk*H input rows, each row packed (W, Cin)
    w1e_ref : (3, W*Cin, W*P)   conv1 row-fused banded weights (bf16, one per dy)
    w2e_ref : (3, W*P,  W*P)    conv2 row-fused banded weights (bf16)
    wde_ref : (W*Cin, W*P)      block-diagonal 1x1 downsample (bf16, optional)
    s*/b*   : (1, W*P)          folded BN scale / bias (f32), tiled over W
    out_ref : (M, W*P)
    """

    def body(x_ref, w1e_ref, w2e_ref, wde_ref, s1_ref, b1_ref, s2_ref, b2_ref,
             sd_ref, bd_ref, out_ref):
        M = x_ref.shape[0]                       # b_blk * H rows

        xf = x_ref[...]                          # (M, W*Cin) f32
        xb = xf.astype(jnp.bfloat16)

        # Per-image boundary-row masks: rolled contributions must not leak
        # across the zero 'SAME' padding at row 0 / row H-1 of each image
        # (also kills the cyclic wrap-around of the roll).
        row_in_img = lax.broadcasted_iota(jnp.int32, (M, 1), 0) % H
        not_first = row_in_img != 0
        not_last = row_in_img != (H - 1)

        def conv3x3(a_f32, a_b16, w_ref):
            # out[m] = in[m-1] @ w[0] + in[m] @ w[1] + in[m+1] @ w[2]
            up = jnp.where(not_first, pltpu.roll(a_f32, shift=1, axis=0), 0.0)
            dn = jnp.where(not_last, pltpu.roll(a_f32, shift=M - 1, axis=0), 0.0)
            acc = jnp.dot(up.astype(jnp.bfloat16), w_ref[0],
                          preferred_element_type=jnp.float32)
            acc = acc + jnp.dot(a_b16, w_ref[1],
                                preferred_element_type=jnp.float32)
            acc = acc + jnp.dot(dn.astype(jnp.bfloat16), w_ref[2],
                                preferred_element_type=jnp.float32)
            return acc

        # ---- conv1 (3x3, pad=1) + BN1 + ReLU --------------------------------
        h1 = conv3x3(xf, xb, w1e_ref) * s1_ref[...] + b1_ref[...]
        h1 = jnp.maximum(h1, 0.0)

        # ---- conv2 (3x3, pad=1) + BN2 ---------------------------------------
        o2 = conv3x3(h1, h1.astype(jnp.bfloat16), w2e_ref) * s2_ref[...] + b2_ref[...]

        # ---- residual ---------------------------------------------------------
        if has_downsample:
            res = jnp.dot(xb, wde_ref[...], preferred_element_type=jnp.float32)
            res = res * sd_ref[...] + bd_ref[...]
        else:
            res = xf                              # identity: Cin == P, same packing

        # ---- add + ReLU, lane-dense store (W*P lanes) ------------------------
        out_ref[...] = jnp.maximum(o2 + res, 0.0).astype(out_ref.dtype)

    if has_downsample:
        return body

    def body_identity(x_ref, w1e_ref, w2e_ref, s1_ref, b1_ref, s2_ref, b2_ref,
                      out_ref):
        body(x_ref, w1e_ref, w2e_ref, None, s1_ref, b1_ref, s2_ref, b2_ref,
             None, None, out_ref)

    return body_identity


# ----------------------------------------------------------------------------
# weight / BN preprocessing (wrapper side, static)
# ----------------------------------------------------------------------------
def _expand_conv3x3(w, W):
    """(3, 3, Cin, Cout) HWIO -> (3, W*Cin, W*Cout) row-fused banded weights.

    We[dy, i*Cin + c, j*Cout + o] = w[dy, dx, c, o]  where i = j + dx - 1,
    with out-of-range taps dropped (== zero 'SAME' padding along W).
    """
    Cin, Cout = w.shape[2], w.shape[3]
    idx = jnp.arange(W)
    sel = jnp.stack(
        [(idx[:, None] == (idx[None, :] + dx - 1)).astype(w.dtype)
         for dx in range(3)], axis=0)                     # (3, W, W)
    we = jnp.einsum('xij,yxco->yicjo', sel, w)            # (3, W, Cin, W, Cout)
    return we.reshape(3, W * Cin, W * Cout)


def _expand_conv1x1(wd, W):
    """(Cin, Cout) -> block-diagonal (W*Cin, W*Cout) for the packed layout."""
    Cin, Cout = wd.shape
    eye = jnp.eye(W, dtype=wd.dtype)
    return jnp.einsum('ij,co->icjo', eye, wd).reshape(W * Cin, W * Cout)


def _fold_bn(bn, W, eps=1e-5):
    gamma, beta, mean, var = bn
    scale = gamma / jnp.sqrt(var + eps)
    bias = beta - mean * scale
    return (jnp.tile(scale, W).reshape(1, -1).astype(jnp.float32),
            jnp.tile(bias, W).reshape(1, -1).astype(jnp.float32))


def _pick_batch_block(N, H, target_rows=256):
    """Largest divisor of N with b*H <= target_rows, preferring >= 2 grid steps
    so the 'parallel' batch axis can shard across v7x's two TensorCores."""
    cap = max(1, min(N, max(1, target_rows // max(H, 1))))
    divs = [b for b in range(1, cap + 1) if N % b == 0]
    two_step = [b for b in divs if N // b >= 2]
    return max(two_step) if two_step else max(divs)


# ----------------------------------------------------------------------------
# public wrappers
# ----------------------------------------------------------------------------
def basic_block_forward_packed(x_rows, params, W, has_downsample,
                               batch_block=None):
    """Packed-layout entry point: x_rows (N, H, W*Cin) f32 -> (N, H, W*P) f32.

    Use this form to chain BasicBlocks without NCHW<->packed HBM transposes.
    """
    N, H, WC = x_rows.shape
    Cin = params['w1'].shape[2]
    P = params['w1'].shape[-1]
    assert WC == W * Cin
    WP = W * P
    if not has_downsample:
        assert Cin == P, "identity residual requires inplanes == planes"

    b_blk = batch_block if batch_block is not None else _pick_batch_block(N, H)
    n_blocks = pl.cdiv(N, b_blk)
    N_pad = n_blocks * b_blk
    if N_pad != N:
        pad = jnp.zeros((N_pad - N, H, WC), x_rows.dtype)
        x_rows = jnp.concatenate([x_rows, pad], axis=0)

    # Flatten to a (rows, lanes) slab; batch-block = b_blk*H consecutive rows.
    x2d = x_rows.reshape(N_pad * H, WC).astype(jnp.float32)
    MB = b_blk * H

    w1e = _expand_conv3x3(params['w1'], W).astype(jnp.bfloat16)   # (3, WC, WP)
    w2e = _expand_conv3x3(params['w2'], W).astype(jnp.bfloat16)   # (3, WP, WP)
    s1, b1 = _fold_bn(params['bn1'], W)
    s2, b2 = _fold_bn(params['bn2'], W)

    operands = [x2d, w1e, w2e]
    in_specs = [
        pl.BlockSpec((MB, WC), lambda n: (n, 0)),
        pl.BlockSpec((3, WC, WP), lambda n: (0, 0, 0)),
        pl.BlockSpec((3, WP, WP), lambda n: (0, 0, 0)),
    ]
    if has_downsample:
        operands.append(_expand_conv1x1(params['wd'], W).astype(jnp.bfloat16))
        in_specs.append(pl.BlockSpec((WC, WP), lambda n: (0, 0)))

    vec_spec = pl.BlockSpec((1, WP), lambda n: (0, 0))
    operands += [s1, b1, s2, b2]
    in_specs += [vec_spec] * 4
    if has_downsample:
        sd, bd = _fold_bn(params['bnd'], W)
        operands += [sd, bd]
        in_specs += [vec_spec] * 2

    kernel = _make_basic_block_kernel(H, has_downsample)

    out2d = pl.pallas_call(
        kernel,
        out_shape=jax.ShapeDtypeStruct((N_pad * H, WP), jnp.float32),
        grid_spec=pltpu.PrefetchScalarGridSpec(
            num_scalar_prefetch=0,
            grid=(n_blocks,),
            in_specs=in_specs,
            out_specs=pl.BlockSpec((MB, WP), lambda n: (n, 0)),
        ),
        compiler_params=pltpu.CompilerParams(
            dimension_semantics=("parallel",)),
    )(*operands)

    return out2d.reshape(N_pad, H, WP)[:N]


def basic_block_forward(x_nchw, params, has_downsample, batch_block=None):
    """NCHW entry/exit wrapper: (N, Cin, H, W) f32 -> (N, P, H, W) f32 (stride=1)."""
    N, Cin, H, W = x_nchw.shape
    P = params['w1'].shape[-1]
    # NCHW -> NHWC, pack (W, C) into the lane axis: (N, H, W*C).
    x_rows = jnp.transpose(x_nchw, (0, 2, 3, 1)).reshape(N, H, W * Cin)
    out_rows = basic_block_forward_packed(x_rows, params, W, has_downsample,
                                          batch_block)
    out = out_rows.reshape(N, H, W, P)
    return jnp.transpose(out, (0, 3, 1, 2))


# ----------------------------------------------------------------------------
# params + pure-JAX reference
# ----------------------------------------------------------------------------
def make_params(key, inplanes, planes, has_downsample):
    ks = jax.random.split(key, 6)

    def bn_params(k, c):
        k1, k2, k3, k4 = jax.random.split(k, 4)
        gamma = 1.0 + 0.1 * jax.random.normal(k1, (c,), jnp.float32)
        beta = 0.1 * jax.random.normal(k2, (c,), jnp.float32)
        mean = 0.1 * jax.random.normal(k3, (c,), jnp.float32)
        var = 0.5 + jnp.abs(jax.random.normal(k4, (c,), jnp.float32))
        return (gamma, beta, mean, var)

    params = dict(
        w1=0.1 * jax.random.normal(ks[0], (3, 3, inplanes, planes), jnp.float32),
        w2=0.1 * jax.random.normal(ks[1], (3, 3, planes, planes), jnp.float32),
        bn1=bn_params(ks[2], planes),
        bn2=bn_params(ks[3], planes),
    )
    if has_downsample:
        params['wd'] = 0.1 * jax.random.normal(
            ks[4], (inplanes, planes), jnp.float32)
        params['bnd'] = bn_params(ks[5], planes)
    return params


def reference_forward(x_nchw, params, has_downsample):
    """Pure-JAX f32 reference (lax convs, NHWC) for correctness checking."""
    x = jnp.transpose(x_nchw, (0, 2, 3, 1))
    Cin = x.shape[-1]
    P = params['w1'].shape[-1]

    def bn(y, p, eps=1e-5):
        g, b, m, v = p
        return (y - m) / jnp.sqrt(v + eps) * g + b

    dn = ('NHWC', 'HWIO', 'NHWC')
    o = lax.conv_general_dilated(x, params['w1'], (1, 1), 'SAME',
                                 dimension_numbers=dn)
    o = jnp.maximum(bn(o, params['bn1']), 0.0)
    o = lax.conv_general_dilated(o, params['w2'], (1, 1), 'SAME',
                                 dimension_numbers=dn)
    o = bn(o, params['bn2'])
    if has_downsample:
        wd = params['wd'].reshape(1, 1, Cin, P)
        r = lax.conv_general_dilated(x, wd, (1, 1), 'SAME',
                                     dimension_numbers=dn)
        r = bn(r, params['bnd'])
    else:
        r = x
    out = jnp.maximum(o + r, 0.0)
    return jnp.transpose(out, (0, 3, 1, 2))


if __name__ == "__main__":
    key = jax.random.PRNGKey(0)
    kx1, kp1, kx2, kp2 = jax.random.split(key, 4)

    # bf16 MXU operands vs f32 reference -> loose tolerance
    TOL = dict(atol=5e-2, rtol=5e-2)

    # case 1: inplanes != planes -> 1x1 downsample + BN on the residual.
    # N=4 so the batch-blocked grid runs 2 steps of 2 images (M = 32 rows).
    N, Cin, P, H, W = 4, 4, 8, 16, 16
    x = jax.random.normal(kx1, (N, Cin, H, W), jnp.float32)
    params = make_params(kp1, Cin, P, has_downsample=True)
    out = jax.block_until_ready(basic_block_forward(x, params, True))
    ref = reference_forward(x, params, True)
    assert out.shape == (N, P, H, W)
    assert jnp.allclose(out, ref, **TOL), "downsample mismatch"

    # case 2: inplanes == planes -> identity residual (specialized path)
    N2 = 2
    Cin2 = P2 = 8
    x2 = jax.random.normal(kx2, (N2, Cin2, H, W), jnp.float32)
    params2 = make_params(kp2, Cin2, P2, has_downsample=False)
    out2 = jax.block_until_ready(basic_block_forward(x2, params2, False))
    ref2 = reference_forward(x2, params2, False)
    assert out2.shape == (N2, P2, H, W)
    assert jnp.allclose(out2, ref2, **TOL), "identity mismatch"

    print("KERNEL_OK")
</pallas_src>

<mosaic_0001>
module attributes {stable_mosaic.version = 11 : i64} {
  func.func @body(%arg0: i32, %arg1: memref<32x64xf32, #tpu.memory_space<vmem>>, %arg2: memref<3x64x128xbf16, #tpu.memory_space<vmem>>, %arg3: memref<3x128x128xbf16, #tpu.memory_space<vmem>>, %arg4: memref<64x128xbf16, #tpu.memory_space<vmem>>, %arg5: memref<1x128xf32, #tpu.memory_space<vmem>>, %arg6: memref<1x128xf32, #tpu.memory_space<vmem>>, %arg7: memref<1x128xf32, #tpu.memory_space<vmem>>, %arg8: memref<1x128xf32, #tpu.memory_space<vmem>>, %arg9: memref<1x128xf32, #tpu.memory_space<vmem>>, %arg10: memref<1x128xf32, #tpu.memory_space<vmem>>, %arg11: memref<32x128xf32, #tpu.memory_space<vmem>>) attributes {dimension_semantics = [#tpu.dimension_semantics<parallel>], iteration_bounds = array<i64: 2>, scalar_prefetch = 0 : i64, scratch_operands = 0 : i64, tpu.core_type = #tpu.core_type<tc>, window_params = [{transform_indices = @transform_0, window_bounds = array<i64: 32, 64>}, {pipeline_mode = #tpu.pipeline_mode<synchronous>, transform_indices = @transform_1, window_bounds = array<i64: 3, 64, 128>}, {pipeline_mode = #tpu.pipeline_mode<synchronous>, transform_indices = @transform_2, window_bounds = array<i64: 3, 128, 128>}, {pipeline_mode = #tpu.pipeline_mode<synchronous>, transform_indices = @transform_3, window_bounds = array<i64: 64, 128>}, {pipeline_mode = #tpu.pipeline_mode<synchronous>, transform_indices = @transform_4, window_bounds = array<i64: 1, 128>}, {pipeline_mode = #tpu.pipeline_mode<synchronous>, transform_indices = @transform_5, window_bounds = array<i64: 1, 128>}, {pipeline_mode = #tpu.pipeline_mode<synchronous>, transform_indices = @transform_6, window_bounds = array<i64: 1, 128>}, {pipeline_mode = #tpu.pipeline_mode<synchronous>, transform_indices = @transform_7, window_bounds = array<i64: 1, 128>}, {pipeline_mode = #tpu.pipeline_mode<synchronous>, transform_indices = @transform_8, window_bounds = array<i64: 1, 128>}, {pipeline_mode = #tpu.pipeline_mode<synchronous>, transform_indices = @transform_9, window_bounds = array<i64: 1, 128>}, {transform_indices = @transform_10, window_bounds = array<i64: 32, 128>}]} {
    %c0 = arith.constant 0 : index
    %c0_0 = arith.constant 0 : index
    %0 = vector.load %arg1[%c0, %c0_0] : memref<32x64xf32, #tpu.memory_space<vmem>>, vector<32x64xf32>
    %1 = arith.truncf %0 : vector<32x64xf32> to vector<32x64xbf16>
    %2 = tpu.iota {dimensions = array<i32: 0>} : vector<32x1xi32>
    %c16_i32 = arith.constant 16 : i32
    %c0_i32 = arith.constant 0 : i32
    %3 = arith.cmpi eq, %c16_i32, %c0_i32 : i32
    %c1_i32 = arith.constant 1 : i32
    %4 = arith.select %3, %c1_i32, %c16_i32 : i32
    %5 = vector.broadcast %4 : i32 to vector<32x1xi32>
    %6 = arith.remsi %2, %5 : vector<32x1xi32>
    %c0_i32_1 = arith.constant 0 : i32
    %7 = vector.broadcast %c0_i32_1 : i32 to vector<32x1xi32>
    %8 = arith.cmpi ne, %6, %7 : vector<32x1xi32>
    %c0_i32_2 = arith.constant 0 : i32
    %9 = vector.broadcast %c0_i32_2 : i32 to vector<32x1xi32>
    %10 = arith.cmpi slt, %6, %9 : vector<32x1xi32>
    %c0_i32_3 = arith.constant 0 : i32
    %11 = arith.cmpi slt, %4, %c0_i32_3 : i32
    %12 = vector.broadcast %11 : i1 to vector<32x1xi1>
    %13 = vector.broadcast %12 : vector<32x1xi1> to vector<32x1xi1>
    %14 = arith.xori %10, %13 : vector<32x1xi1>
    %15 = arith.andi %14, %8 : vector<32x1xi1>
    %16 = vector.broadcast %4 : i32 to vector<32x1xi32>
    %17 = arith.addi %6, %16 : vector<32x1xi32>
    %18 = arith.select %15, %17, %6 : vector<32x1xi1>, vector<32x1xi32>
    %c0_i32_4 = arith.constant 0 : i32
    %19 = vector.broadcast %c0_i32_4 : i32 to vector<32x1xi32>
    %20 = arith.cmpi ne, %18, %19 : vector<32x1xi32>
    %c15_i32 = arith.constant 15 : i32
    %21 = vector.broadcast %c15_i32 : i32 to vector<32x1xi32>
    %22 = arith.cmpi ne, %18, %21 : vector<32x1xi32>
    %c1_i32_5 = arith.constant 1 : i32
    %23 = tpu.dynamic_rotate %0 by %c1_i32_5 dim 0 : vector<32x64xf32>, i32 -> vector<32x64xf32>
    %cst = arith.constant 0.000000e+00 : f32
    %24 = vector.shape_cast %20 : vector<32x1xi1> to vector<32x1xi1>
    %25 = vector.broadcast %24 : vector<32x1xi1> to vector<32x64xi1>
    %26 = vector.broadcast %cst : f32 to vector<32x64xf32>
    %27 = arith.select %25, %23, %26 : vector<32x64xi1>, vector<32x64xf32>
    %c31_i32 = arith.constant 31 : i32
    %28 = tpu.dynamic_rotate %0 by %c31_i32 dim 0 : vector<32x64xf32>, i32 -> vector<32x64xf32>
    %cst_6 = arith.constant 0.000000e+00 : f32
    %29 = vector.shape_cast %22 : vector<32x1xi1> to vector<32x1xi1>
    %30 = vector.broadcast %29 : vector<32x1xi1> to vector<32x64xi1>
    %31 = vector.broadcast %cst_6 : f32 to vector<32x64xf32>
    %32 = arith.select %30, %28, %31 : vector<32x64xi1>, vector<32x64xf32>
    %33 = arith.truncf %27 : vector<32x64xf32> to vector<32x64xbf16>
    %c0_7 = arith.constant 0 : index
    %c0_8 = arith.constant 0 : index
    %c0_9 = arith.constant 0 : index
    %34 = vector.load %arg2[%c0_7, %c0_8, %c0_9] : memref<3x64x128xbf16, #tpu.memory_space<vmem>>, vector<1x64x128xbf16>
    %35 = vector.shape_cast %34 : vector<1x64x128xbf16> to vector<64x128xbf16>
    %cst_10 = arith.constant dense<0.000000e+00> : vector<32x128xf32>
    %36 = tpu.matmul %33, %35, %cst_10 {dimension_numbers = #tpu.dot_dimension_numbers<[1], [0], [0], [1], [0, 0, 1, 1], [], []>} : vector<32x64xbf16>, vector<64x128xbf16>, vector<32x128xf32> -> vector<32x128xf32>
    %c1 = arith.constant 1 : index
    %c0_11 = arith.constant 0 : index
    %c0_12 = arith.constant 0 : index
    %37 = vector.load %arg2[%c1, %c0_11, %c0_12] : memref<3x64x128xbf16, #tpu.memory_space<vmem>>, vector<1x64x128xbf16>
    %38 = vector.shape_cast %37 : vector<1x64x128xbf16> to vector<64x128xbf16>
    %cst_13 = arith.constant dense<0.000000e+00> : vector<32x128xf32>
    %39 = tpu.matmul %1, %38, %cst_13 {dimension_numbers = #tpu.dot_dimension_numbers<[1], [0], [0], [1], [0, 0, 1, 1], [], []>} : vector<32x64xbf16>, vector<64x128xbf16>, vector<32x128xf32> -> vector<32x128xf32>
    %40 = arith.addf %36, %39 : vector<32x128xf32>
    %41 = arith.truncf %32 : vector<32x64xf32> to vector<32x64xbf16>
    %c2 = arith.constant 2 : index
    %c0_14 = arith.constant 0 : index
    %c0_15 = arith.constant 0 : index
    %42 = vector.load %arg2[%c2, %c0_14, %c0_15] : memref<3x64x128xbf16, #tpu.memory_space<vmem>>, vector<1x64x128xbf16>
    %43 = vector.shape_cast %42 : vector<1x64x128xbf16> to vector<64x128xbf16>
    %cst_16 = arith.constant dense<0.000000e+00> : vector<32x128xf32>
    %44 = tpu.matmul %41, %43, %cst_16 {dimension_numbers = #tpu.dot_dimension_numbers<[1], [0], [0], [1], [0, 0, 1, 1], [], []>} : vector<32x64xbf16>, vector<64x128xbf16>, vector<32x128xf32> -> vector<32x128xf32>
    %45 = arith.addf %40, %44 : vector<32x128xf32>
    %c0_17 = arith.constant 0 : index
    %c0_18 = arith.constant 0 : index
    %46 = vector.load %arg5[%c0_17, %c0_18] : memref<1x128xf32, #tpu.memory_space<vmem>>, vector<1x128xf32>
    %47 = vector.broadcast %46 : vector<1x128xf32> to vector<32x128xf32>
    %48 = arith.mulf %45, %47 : vector<32x128xf32>
    %c0_19 = arith.constant 0 : index
    %c0_20 = arith.constant 0 : index
    %49 = vector.load %arg6[%c0_19, %c0_20] : memref<1x128xf32, #tpu.memory_space<vmem>>, vector<1x128xf32>
    %50 = vector.broadcast %49 : vector<1x128xf32> to vector<32x128xf32>
    %51 = arith.addf %48, %50 : vector<32x128xf32>
    %cst_21 = arith.constant 0.000000e+00 : f32
    %52 = vector.broadcast %cst_21 : f32 to vector<32x128xf32>
    %53 = arith.maximumf %51, %52 : vector<32x128xf32>
    %54 = arith.truncf %53 : vector<32x128xf32> to vector<32x128xbf16>
    %c1_i32_22 = arith.constant 1 : i32
    %55 = tpu.dynamic_rotate %53 by %c1_i32_22 dim 0 : vector<32x128xf32>, i32 -> vector<32x128xf32>
    %cst_23 = arith.constant 0.000000e+00 : f32
    %56 = vector.shape_cast %20 : vector<32x1xi1> to vector<32x1xi1>
    %57 = vector.broadcast %56 : vector<32x1xi1> to vector<32x128xi1>
    %58 = vector.broadcast %cst_23 : f32 to vector<32x128xf32>
    %59 = arith.select %57, %55, %58 : vector<32x128xi1>, vector<32x128xf32>
    %c31_i32_24 = arith.constant 31 : i32
    %60 = tpu.dynamic_rotate %53 by %c31_i32_24 dim 0 : vector<32x128xf32>, i32 -> vector<32x128xf32>
    %cst_25 = arith.constant 0.000000e+00 : f32
    %61 = vector.shape_cast %22 : vector<32x1xi1> to vector<32x1xi1>
    %62 = vector.broadcast %61 : vector<32x1xi1> to vector<32x128xi1>
    %63 = vector.broadcast %cst_25 : f32 to vector<32x128xf32>
    %64 = arith.select %62, %60, %63 : vector<32x128xi1>, vector<32x128xf32>
    %65 = arith.truncf %59 : vector<32x128xf32> to vector<32x128xbf16>
    %c0_26 = arith.constant 0 : index
    %c0_27 = arith.constant 0 : index
    %c0_28 = arith.constant 0 : index
    %66 = vector.load %arg3[%c0_26, %c0_27, %c0_28] : memref<3x128x128xbf16, #tpu.memory_space<vmem>>, vector<1x128x128xbf16>
    %67 = vector.shape_cast %66 : vector<1x128x128xbf16> to vector<128x128xbf16>
    %cst_29 = arith.constant dense<0.000000e+00> : vector<32x128xf32>
    %68 = tpu.matmul %65, %67, %cst_29 {dimension_numbers = #tpu.dot_dimension_numbers<[1], [0], [0], [1], [0, 0, 1, 1], [], []>} : vector<32x128xbf16>, vector<128x128xbf16>, vector<32x128xf32> -> vector<32x128xf32>
    %c1_30 = arith.constant 1 : index
    %c0_31 = arith.constant 0 : index
    %c0_32 = arith.constant 0 : index
    %69 = vector.load %arg3[%c1_30, %c0_31, %c0_32] : memref<3x128x128xbf16, #tpu.memory_space<vmem>>, vector<1x128x128xbf16>
    %70 = vector.shape_cast %69 : vector<1x128x128xbf16> to vector<128x128xbf16>
    %cst_33 = arith.constant dense<0.000000e+00> : vector<32x128xf32>
    %71 = tpu.matmul %54, %70, %cst_33 {dimension_numbers = #tpu.dot_dimension_numbers<[1], [0], [0], [1], [0, 0, 1, 1], [], []>} : vector<32x128xbf16>, vector<128x128xbf16>, vector<32x128xf32> -> vector<32x128xf32>
    %72 = arith.addf %68, %71 : vector<32x128xf32>
    %73 = arith.truncf %64 : vector<32x128xf32> to vector<32x128xbf16>
    %c2_34 = arith.constant 2 : index
    %c0_35 = arith.constant 0 : index
    %c0_36 = arith.constant 0 : index
    %74 = vector.load %arg3[%c2_34, %c0_35, %c0_36] : memref<3x128x128xbf16, #tpu.memory_space<vmem>>, vector<1x128x128xbf16>
    %75 = vector.shape_cast %74 : vector<1x128x128xbf16> to vector<128x128xbf16>
    %cst_37 = arith.constant dense<0.000000e+00> : vector<32x128xf32>
    %76 = tpu.matmul %73, %75, %cst_37 {dimension_numbers = #tpu.dot_dimension_numbers<[1], [0], [0], [1], [0, 0, 1, 1], [], []>} : vector<32x128xbf16>, vector<128x128xbf16>, vector<32x128xf32> -> vector<32x128xf32>
    %77 = arith.addf %72, %76 : vector<32x128xf32>
    %c0_38 = arith.constant 0 : index
    %c0_39 = arith.constant 0 : index
    %78 = vector.load %arg7[%c0_38, %c0_39] : memref<1x128xf32, #tpu.memory_space<vmem>>, vector<1x128xf32>
    %79 = vector.broadcast %78 : vector<1x128xf32> to vector<32x128xf32>
    %80 = arith.mulf %77, %79 : vector<32x128xf32>
    %c0_40 = arith.constant 0 : index
    %c0_41 = arith.constant 0 : index
    %81 = vector.load %arg8[%c0_40, %c0_41] : memref<1x128xf32, #tpu.memory_space<vmem>>, vector<1x128xf32>
    %82 = vector.broadcast %81 : vector<1x128xf32> to vector<32x128xf32>
    %83 = arith.addf %80, %82 : vector<32x128xf32>
    %c0_42 = arith.constant 0 : index
    %c0_43 = arith.constant 0 : index
    %84 = vector.load %arg4[%c0_42, %c0_43] : memref<64x128xbf16, #tpu.memory_space<vmem>>, vector<64x128xbf16>
    %cst_44 = arith.constant dense<0.000000e+00> : vector<32x128xf32>
    %85 = tpu.matmul %1, %84, %cst_44 {dimension_numbers = #tpu.dot_dimension_numbers<[1], [0], [0], [1], [0, 0, 1, 1], [], []>} : vector<32x64xbf16>, vector<64x128xbf16>, vector<32x128xf32> -> vector<32x128xf32>
    %c0_45 = arith.constant 0 : index
    %c0_46 = arith.constant 0 : index
    %86 = vector.load %arg9[%c0_45, %c0_46] : memref<1x128xf32, #tpu.memory_space<vmem>>, vector<1x128xf32>
    %87 = vector.broadcast %86 : vector<1x128xf32> to vector<32x128xf32>
    %88 = arith.mulf %85, %87 : vector<32x128xf32>
    %c0_47 = arith.constant 0 : index
    %c0_48 = arith.constant 0 : index
    %89 = vector.load %arg10[%c0_47, %c0_48] : memref<1x128xf32, #tpu.memory_space<vmem>>, vector<1x128xf32>
    %90 = vector.broadcast %89 : vector<1x128xf32> to vector<32x128xf32>
    %91 = arith.addf %88, %90 : vector<32x128xf32>
    %92 = arith.addf %83, %91 : vector<32x128xf32>
    %cst_49 = arith.constant 0.000000e+00 : f32
    %93 = vector.broadcast %cst_49 : f32 to vector<32x128xf32>
    %94 = arith.maximumf %92, %93 : vector<32x128xf32>
    %c0_50 = arith.constant 0 : index
    %c0_51 = arith.constant 0 : index
    %95 = vector.load %arg11[%c0_50, %c0_51] : memref<32x128xf32, #tpu.memory_space<vmem>>, vector<32x128xf32>
    tpu.vector_store %arg11[%c0_50, %c0_51], %94 {strides = array<i32>} : memref<32x128xf32, #tpu.memory_space<vmem>>, vector<32x128xf32>,
    return
  }
  func.func @transform_0(%arg0: i32) -> (i32, i32) {
    %c0_i32 = arith.constant 0 : i32
    %c0_i32_0 = arith.constant 0 : i32
    return %arg0, %c0_i32 : i32, i32
  }
  func.func @transform_1(%arg0: i32) -> (i32, i32, i32) {
    %c0_i32 = arith.constant 0 : i32
    %c0_i32_0 = arith.constant 0 : i32
    %c0_i32_1 = arith.constant 0 : i32
    %c0_i32_2 = arith.constant 0 : i32
    return %c0_i32, %c0_i32_0, %c0_i32_1 : i32, i32, i32
  }
  func.func @transform_2(%arg0: i32) -> (i32, i32, i32) {
    %c0_i32 = arith.constant 0 : i32
    %c0_i32_0 = arith.constant 0 : i32
    %c0_i32_1 = arith.constant 0 : i32
    %c0_i32_2 = arith.constant 0 : i32
    return %c0_i32, %c0_i32_0, %c0_i32_1 : i32, i32, i32
  }
  func.func @transform_3(%arg0: i32) -> (i32, i32) {
    %c0_i32 = arith.constant 0 : i32
    %c0_i32_0 = arith.constant 0 : i32
    %c0_i32_1 = arith.constant 0 : i32
    return %c0_i32, %c0_i32_0 : i32, i32
  }
  func.func @transform_4(%arg0: i32) -> (i32, i32) {
    %c0_i32 = arith.constant 0 : i32
    %c0_i32_0 = arith.constant 0 : i32
    %c0_i32_1 = arith.constant 0 : i32
    return %c0_i32, %c0_i32_0 : i32, i32
  }
  func.func @transform_5(%arg0: i32) -> (i32, i32) {
    %c0_i32 = arith.constant 0 : i32
    %c0_i32_0 = arith.constant 0 : i32
    %c0_i32_1 = arith.constant 0 : i32
    return %c0_i32, %c0_i32_0 : i32, i32
  }
  func.func @transform_6(%arg0: i32) -> (i32, i32) {
    %c0_i32 = arith.constant 0 : i32
    %c0_i32_0 = arith.constant 0 : i32
    %c0_i32_1 = arith.constant 0 : i32
    return %c0_i32, %c0_i32_0 : i32, i32
  }
  func.func @transform_7(%arg0: i32) -> (i32, i32) {
    %c0_i32 = arith.constant 0 : i32
    %c0_i32_0 = arith.constant 0 : i32
    %c0_i32_1 = arith.constant 0 : i32
    return %c0_i32, %c0_i32_0 : i32, i32
  }
  func.func @transform_8(%arg0: i32) -> (i32, i32) {
    %c0_i32 = arith.constant 0 : i32
    %c0_i32_0 = arith.constant 0 : i32
    %c0_i32_1 = arith.constant 0 : i32
    return %c0_i32, %c0_i32_0 : i32, i32
  }
  func.func @transform_9(%arg0: i32) -> (i32, i32) {
    %c0_i32 = arith.constant 0 : i32
    %c0_i32_0 = arith.constant 0 : i32
    %c0_i32_1 = arith.constant 0 : i32
    return %c0_i32, %c0_i32_0 : i32, i32
  }
  func.func @transform_10(%arg0: i32) -> (i32, i32) {
    %c0_i32 = arith.constant 0 : i32
    %c0_i32_0 = arith.constant 0 : i32
    return %arg0, %c0_i32 : i32, i32
  }
}

</mosaic_0001>

<bundles_post_ra>
// kernel: tpu_custom_call.1
= control target key start
LH: loop header
LB: loop body
LE: loop exit
PB: predicated region body
PF: predicated region fallthrough
CT: control target
= control target key end

     0   :  { %s2525_s0 = inlined_call_operand.hbm [shape: f32[64,64], index: 0, kind: input, shape index: {}]   ;;  %s2526_s1 = inlined_call_operand.hbm [shape: bf16[3,64,128], index: 1, kind: input, shape index: {}]   ;;  %s2527_s2 = inlined_call_operand.hbm [shape: bf16[3,128,128], index: 2, kind: input, shape index: {}]   ;;  %s2528_s3 = inlined_call_operand.hbm [shape: bf16[64,128], index: 3, kind: input, shape index: {}]   ;;  %s2529_s4 = inlined_call_operand.vmem [shape: f32[1,128], index: 4, kind: input, shape index: {}]   ;;  %s2530_s5 = inlined_call_operand.vmem [shape: f32[1,128], index: 5, kind: input, shape index: {}]   ;;  %s2531_s6 = inlined_call_operand.vmem [shape: f32[1,128], index: 6, kind: input, shape index: {}]   ;;  %s2532_s7 = inlined_call_operand.vmem [shape: f32[1,128], index: 7, kind: input, shape index: {}]   ;;  %s2533_s8 = inlined_call_operand.vmem [shape: f32[1,128], index: 8, kind: input, shape index: {}]   ;;  %s2534_s9 = inlined_call_operand.vmem [shape: f32[1,128], index: 9, kind: input, shape index: {}]   ;;  %s2535_s10 = inlined_call_operand.hbm [shape: f32[64,128], index: 10, kind: output, shape index: {}]  }
   0x1   :  { %2542 = sst [smem:[#allocation17_spill]] %s2532_s7 }
   0x2   :  { %2543 = sst [smem:[#allocation18_spill]] %s2535_s10 }
   0x3   :  { %15 = vsyncpa [#allocation3], 0 }
   0x4   :  { %17 = vsyncpa [#allocation3 + $0x1], 0 }
   0x5   :  { %18 = vsyncpa [#allocation6], 0 }
   0x6   :  { %19 = vsyncpa [#allocation9], 0 }
   0x7   :  { %20 = vsyncpa [#allocation4], 0 }
   0x8   :  { %22 = vsyncpa [#allocation4 + $0x1], 0  ;;  %s2107_s13 = smov 0   ;;  %s2109_s14 = smov 0  }
   0x9   :  { %s2111_s15 = smov 0   ;;  %s2113_s16 = smov 0  }
   0xa LB: > { %2544 = sst [smem:[#allocation15_spill]] %s2026_s13  ;;  %s2128_s17 = sadd.s32 4294967295, %s2038_s16   ;;  %s2038_s16 = sphi %s2113_s16, %s2578_s16   ;;  %s2034_s15 = sphi %s2111_s15, %s2577_s15   ;;  %s2030_s14 = sphi %s2109_s14, %s2576_s14   ;;  %s2026_s13 = sphi %s2107_s13, %s2575_s13  }
   0xb   : > { %s1460_s18 = sadd.s32 4294967294, %s2038_s16   ;;  %p48_p0 = scmp.ne.s32.totalorder %s2030_s14, %s2026_s13 }
   0xc   : > { %p2536_p1 = scmp.eq.s32.totalorder %s2128_s17, 0  ;;  %p267_p3 = scmp.eq.s32.totalorder %s1460_s18, 1 }
   0xd   : > { %p1461_p5 = scmp.ge.s32.totalorder %s2038_s16, 1  ;;  %p274_p7 = scmp.lt.s32.totalorder %s2038_s16, 3 }
   0xe   : > { %p2137_p4 = por %p2536_p1, %p48_p0  ;;  %p2142_p6 = por %p267_p3, %p48_p0 }
   0xf   : > { %p2147_p8 = pnand %p1461_p5, %p274_p7  ;;  %s2040_s22 = smov [#allocation5]  }
  0x10   : > { %s2545_s19 = scalar_select %p2137_p4, 1, 0 }
  0x11   : > { %s2546_s20 = scalar_select %p2142_p6, 1, 0 }
  0x12   : > { %s2548_s21 = scalar_select %p2147_p8, 1, 0 }
  0x13   : > { %2547 = sst [smem:[#allocation16_spill]] %s2546_s20  ;;  %s286_s23 = sshll.u32 %s2040_s22, 4  ;;  %s2151_s23 = int_to_ptr.vmem [resolvable:$true] %s286_s23 }
  0x14   : > { %p1742_p9 = pneg %p2147_p8  ;;  %s2041_s25 = smov [#allocation7]  }
  0x15   : > { %s299_s26 = sshll.u32 %s2041_s25, 4  ;;  %s2042_s27 = smov [#allocation8]   ;;  %s2162_s26 = int_to_ptr.vmem [resolvable:$true] %s299_s26 }
  0x16   : > { %p2158_p11 = pnand %p1742_p9, %p2536_p1  ;;  %s2164_s28 = sshll.u32 %s2042_s27, 4  ;;  %s313_s28 = int_to_ptr.vmem [resolvable:$true] %s2164_s28 }
  0x17   : > { %s1850_s11 = scalar_lea.hbm %s2526_s1, 1536 }
  0x18   : > { %p1851_p12 = scmp.ne.s32.totalorder %s2526_s1, %s1850_s11  ;;  %p2174_p13 = pneg %p2158_p11 }
  0x19   : > { %p1857_p5 = scmp.lt.u32.totalorder %s1850_s11, %s2526_s1 }
  0x1a   : > { %p1853_p0 = pnand %p2174_p13, %p1851_p12 }
  0x1c   : > { %p1854_p3 = pneg %p1853_p0 }
  0x1e   : > { %p1859_p7 = pnand %p1857_p5, %p1854_p3 }
  0x20   : > { %1862 = shalt.err (!%p1859_p7)
}
  0x21   : > { %s1863_s29 = scalar_lea.vmem %s2151_s23, 1536  ;;  %p1871_p2 = scmp.lt.s32.totalorder %s2151_s23, %s2151_s23 }
  0x22   : > { %p1864_p9 = scmp.ne.s32.totalorder %s2151_s23, %s1863_s29  ;;  %p1872_p6 = scmp.lt.s32.totalorder %s1863_s29, %s1863_s29 }
  0x24   : > { %p1866_p10 = pnand %p1864_p9, %p2174_p13  ;;  %p1873_p12 = por %p1872_p6, %p1871_p2 }
  0x26   : > { %p1867_p1 = pneg %p1866_p10 }
  0x28   : > { %p1874_p0 = pnand %p1873_p12, %p1867_p1 }
  0x2a   : > { %1877 = shalt.err (!%p1874_p0)
}
  0x2b   : > { %s2043_s30 = smov 64   ;;  %s2044_s11 = smov 4  }
  0x2c   : > { %1745 = dma.hbm_to_vmem [thread:$0]  (!%p2158_p11), %s2526_s1, 1536, %s2151_s23, [#allocation6], %s2043_s30, %s2043_s30, %s2044_s11  }
  0x2d   : > { %s1878_s29 = scalar_lea.hbm %s2527_s2, 3072 }
  0x2e   : > { %p1879_p1 = scmp.ne.s32.totalorder %s2527_s2, %s1878_s29  ;;  %p1885_p10 = scmp.lt.u32.totalorder %s1878_s29, %s2527_s2 }
  0x30   : > { %p1881_p2 = pnand %p1879_p1, %p2174_p13 }
  0x32   : > { %p1882_p6 = pneg %p1881_p2 }
  0x34   : > { %p1887_p3 = pnand %p1885_p10, %p1882_p6 }
  0x36   : > { %1890 = shalt.err (!%p1887_p3)
}
  0x37   : > { %s1891_s23 = scalar_lea.vmem %s2162_s26, 3072  ;;  %p1899_p12 = scmp.lt.s32.totalorder %s2162_s26, %s2162_s26 }
  0x38   : > { %p1892_p5 = scmp.ne.s32.totalorder %s2162_s26, %s1891_s23  ;;  %p1900_p0 = scmp.lt.s32.totalorder %s1891_s23, %s1891_s23 }
  0x3a   : > { %p1894_p7 = pnand %p1892_p5, %p2174_p13  ;;  %p1901_p1 = por %p1900_p0, %p1899_p12 }
  0x3c   : > { %p1895_p9 = pneg %p1894_p7 }
  0x3e   : > { %p1902_p2 = pnand %p1901_p1, %p1895_p9 }
  0x40   : > { %1905 = shalt.err (!%p1902_p2)
}
  0x41   : > { %1748 = dma.hbm_to_vmem [thread:$0]  (!%p2158_p11), %s2527_s2, 3072, %s2162_s26, [#allocation6], %s2043_s30, %s2043_s30, %s2044_s11  }
  0x42   : > { %s1906_s12 = scalar_lea.hbm %s2528_s3, 512 }
  0x43   : > { %p1907_p6 = scmp.ne.s32.totalorder %s2528_s3, %s1906_s12  ;;  %p1913_p5 = scmp.lt.u32.totalorder %s1906_s12, %s2528_s3 }
  0x45   : > { %p1909_p10 = pnand %p1907_p6, %p2174_p13 }
  0x47   : > { %p1910_p3 = pneg %p1909_p10 }
  0x49   : > { %p1915_p7 = pnand %p1913_p5, %p1910_p3 }
  0x4b   : > { %1918 = shalt.err (!%p1915_p7)
}
  0x4c   : > { %s1919_s23 = scalar_lea.vmem %s313_s28, 512  ;;  %p1927_p1 = scmp.lt.s32.totalorder %s313_s28, %s313_s28 }
  0x4d   : > { %p1920_p9 = scmp.ne.s32.totalorder %s313_s28, %s1919_s23  ;;  %p1928_p2 = scmp.lt.s32.totalorder %s1919_s23, %s1919_s23 }
  0x4f   : > { %p1922_p12 = pnand %p1920_p9, %p2174_p13  ;;  %p1929_p4 = por %p1928_p2, %p1927_p1 }
  0x51   : > { %p1923_p0 = pneg %p1922_p12 }
  0x53   : > { %p1930_p8 = pnand %p1929_p4, %p1923_p0 }
  0x55   : > { %1933 = shalt.err (!%p1930_p8)
}
  0x56   : > { %1751 = dma.hbm_to_vmem [thread:$0]  (!%p2158_p11), %s2528_s3, 512, %s313_s28, [#allocation9], %s2043_s30, %s2043_s30, %s2044_s11  }
  0x57   : > { %s2247_s22 = sadd.s32 1, %s2038_s16   ;;  %s35_s10 = sadd.s32 1, %s2034_s15 }
  0x58   : > { %s32_s24 = ssub.s32 %s2038_s16, %s2247_s22  ;;  %p42_p8 = scmp.ne.s32.totalorder %s2034_s15, %s2030_s14 }
  0x59   : > { %p33_p4 = scmp.eq.s32.totalorder %s32_s24, 0  ;;  %p43_p13 = scmp.eq.s32.totalorder %s2038_s16, 0 }
  0x5a   : > { %p1763_p6 = scmp.lt.s32.totalorder %s2038_s16, 2  ;;  %p2551_p3 = scmp.eq.s32.totalorder %s2128_s17, 1 }
  0x5b   : > { %s2257_s13 = scalar_select %p33_p4, %s2034_s15, %s35_s10  }
  0x5c   : > { %p44_p10 = por %p43_p13, %p42_p8  ;;  %p2261_p5 = por %p2551_p3, %p42_p8 }
  0x5d   : > { %s344_s12 = sand.u32 1, %s2034_s15   ;;  %s1546_s18 = sshll.u32 %s2038_s16, 9 }
  0x5e   : > { %s1466_s28 = sshll.u32 %s344_s12, 5  ;;  %s2270_s25 = scalar_lea.hbm %s2525_s0, %s1546_s18 }
  0x5f   : > { %s348_s27 = scalar_lea.vmem [#allocation2], %s1466_s28  ;;  %p2272_p11 = pnand %p1763_p6, %p44_p10 }
  0x60   : > { %s355_s29 = sshll.u32 %s348_s27, 4  ;;  %s2278_s26 = scalar_lea.sflag [#allocation3], %s344_s12  ;;  %s2276_s29 = int_to_ptr.vmem [resolvable:$true] %s355_s29 }
  0x61   : > { %s1934_s7 = scalar_lea.hbm %s2270_s25, 512  ;;  %p1936_p9 = pneg %p2272_p11 }
  0x62   : > { %p1935_p7 = scmp.ne.s32.totalorder %s2270_s25, %s1934_s7  ;;  %s1939_s18 = scalar_lea.hbm %s2525_s0, 1024 }
  0x63   : > { %p1940_p1 = scmp.lt.u32.totalorder %s2270_s25, %s2525_s0  ;;  %p1941_p2 = scmp.lt.u32.totalorder %s1939_s18, %s1934_s7 }
  0x64   : > { %p1937_p12 = pnand %p1936_p9, %p1935_p7  ;;  %p1943_p8 = scmp.lt.u32.totalorder %s1934_s7, %s2270_s25 }
  0x65   : > { %p1942_p4 = por %p1941_p2, %p1940_p1 }
  0x66   : > { %p1938_p0 = pneg %p1937_p12 }
  0x67   : > { %p1944_p13 = por %p1943_p8, %p1942_p4 }
  0x69   : > { %p1945_p6 = pnand %p1944_p13, %p1938_p0 }
  0x6b   : > { %1948 = shalt.err (!%p1945_p6)
}
  0x6c   : > { %s1949_s12 = scalar_lea.vmem %s2276_s29, 512  ;;  %s2045_s11 = smov [#allocation2]  }
  0x6d   : > { %p1950_p10 = scmp.ne.s32.totalorder %s2276_s29, %s1949_s12  ;;  %s1954_s27 = sshll.u32 %s2045_s11, 4  ;;  %s1955_s27 = int_to_ptr.vmem [resolvable:$false] %s1954_s27 }
  0x6e   : > { %s1956_s24 = scalar_lea.vmem %s1955_s27, 1024  ;;  %p1957_p12 = scmp.lt.s32.totalorder %s2276_s29, %s1955_s27 }
  0x6f   : > { %p1952_p3 = pnand %p1950_p10, %p1936_p9  ;;  %p1958_p1 = scmp.lt.s32.totalorder %s1956_s24, %s1949_s12 }
  0x71   : > { %p1953_p7 = pneg %p1952_p3  ;;  %p1959_p2 = por %p1958_p1, %p1957_p12 }
  0x73   : > { %p1960_p4 = pnand %p1959_p2, %p1953_p7 }
  0x75   : > { %1963 = shalt.err (!%p1960_p4)
}
  0x76   : > { %s2046_s7 = smov 128   ;;  %s2047_s10 = smov 8  }
  0x77   : > { %1755 = dma.hbm_to_vmem [thread:$0]  (!%p2272_p11), %s2270_s25, 512, %s2276_s29, %s2278_s26, %s2046_s7, %s2046_s7, %s2047_s10  }
  0x78   : > { %p2554_p9 = scmp.ne.s32.totalorder %s2548_s21, 0 }
  0x79   : > { %s2309_s18 = sand.u32 (!%p2554_p9), 1, %s2030_s14   ;;  %p2555_p0 = scmp.ne.s32.totalorder (!%p2554_p9), %s2545_s19, 0 }
  0x7a   : > { %367 = sbr.rel (%p2554_p9) target bundleno = 712 (0x2c8), region = 60  ;;  %s1470_s28 = sshll.u32 (!%p2554_p9), %s2309_s18, 5 }
  0x7b   : > { %s370_s30 = scalar_lea.sflag (!%p2554_p9), [#allocation3], %s2309_s18  ;;  %s2315_s12 = scalar_lea.vmem (!%p2554_p9), [#allocation2], %s1470_s28 }
  0x81   : > { %2009 = dma.done.wait (%p2555_p0), %s370_s30, 512  }
  0x82   : > { %2011 = vsyncadd (%p2555_p0), %s370_s30, 4294966784  ;;  %p2556_p11 = scmp.eq.s32.totalorder %s2128_s17, 0 }
  0x84   : > { %2013 = dma.done.wait (%p2556_p11), [#allocation6], 4608   ;;  %p2557_p8 = pmov %p2556_p11 }
  0x86   : > { %2015 = vsyncadd (%p2557_p8), [#allocation6], 4294962688  ;;  %p2558_p13 = pmov %p2557_p8 }
  0x87   : > { %p2559_p6 = pmov %p2557_p8 }
  0x88   : > { %2017 = dma.done.wait (%p2558_p13), [#allocation9], 512  }
  0x89   : > { %2019 = vsyncadd (%p2559_p6), [#allocation9], 4294966784  ;;  %v431_v0 = vlaneseq  ;;  %v1810_v2 = vld [vmem:[#allocation5 + $0x20] sm:$0xff]   ;;  %v1811_v3 = vld [vmem:[#allocation5 + $0x28] sm:$0xff]   ;;  %vm577_vm0 = vcmask 523264   ;;  %vm2048_vm7 = vmmov 1  }
  0x8a   : > { %1602 = vmatprep.subr.bf16.mxu0 %v1810_v2  ;;  %v1812_v4 = vld [vmem:[#allocation5 + $0x30] sm:$0xff]   ;;  %v2333_v6 = vld [vmem:[%s2315_s12] sm:$0xff]  ;;  %v2336_v7 = vld [vmem:[%s2315_s12 + $0x8] sm:$0xff]  ;;  %s421_s19 = scalar_lea.vmem [#allocation10], %s1470_s28  ;;  %s1547_s25 = sshll.u32 %s2128_s17, 9 }
  0x8b   : > { %v2329_v1 = vshrl.u32 %v431_v0, 7  ;;  %1603 = vmatpush3.bf16.msra.mxu0 %v1810_v2  ;;  %v2340_v8 = vpack.c.bf16 %v2336_v7, %v2333_v6  ;;  %v492_v9 = vrot.slane %v2333_v6, 7  ;;  %v2345_v11 = vld [vmem:[%s2315_s12 + $0x18] sm:$0xff]  ;;  %v493_v16 = vrot.slane %v2336_v7, 7  ;;  %v2359_v17 = vld [vmem:[%s2315_s12 + $0x10] sm:$0xff]  ;;  %v1814_v24 = vld [vmem:[#allocation5] sm:$0xff]  }
  0x8c   : > { %1604 = vmatprep.subr.bf16.mxu0 %v1811_v3  ;;  %v495_v13 = vrot.slane %v2345_v11, 7  ;;  %v1813_v15 = vld [vmem:[#allocation5 + $0x38] sm:$0xff]   ;;  %v494_v20 = vrot.slane %v2359_v17, 7  ;;  %v514_v22 = vrot.slane %v2336_v7, 1  ;;  %v515_v23 = vrot.slane %v2359_v17, 1  ;;  %v1822_v30 = vld [vmem:[#allocation7 + $0x40] sm:$0xff]  }
  0x8d   : > { %v440_v5 = vand.u32 15, %v2329_v1  ;;  %v434_v10 = vadd.s32 16, %v2329_v1  ;;  %vm496_vm1 = vcmp.lt.s32.totalorder %v2329_v1, 1  ;;  %v433_v12 = vadd.s32 8, %v2329_v1  ;;  %1610 = vmatprep.mubr.msk.bf16.mxu0 %vm577_vm0, %v2340_v8  ;;  %v1823_v34 = vld [vmem:[#allocation7 + $0x48] sm:$0xff]   ;;  %1638 = vmatprep.subr.bf16.mxu1 %v1822_v30  ;;  %v1816_v39 = vld [vmem:[#allocation5 + $0x10] sm:$0xff]  }
  0x8e   : > { %vm517_vm3 = vcmp.lt.s32.totalorder %v2329_v1, 7  ;;  %v500_v18 = vsel %vm496_vm1, %v495_v13, %v492_v9  ;;  %v499_v25 = vsel %vm496_vm1, %v492_v9, %v493_v16  ;;  %v2372_v27 = vpack.c.bf16 %v2345_v11, %v2359_v17  ;;  %v1815_v35 = vld [vmem:[#allocation5 + $0x8] sm:$0xff]   ;;  %1639 = vmatpush3.bf16.msra.mxu1 %v1822_v30  ;;  %v1824_v41 = vld [vmem:[#allocation7 + $0x50] sm:$0xff]   ;;  %v1825_v42 = vld [vmem:[#allocation7 + $0x58] sm:$0xff]   ;;  %s2568_s12 = sld [smem:[#allocation17_spill]]  ;;  %s1358_s21 = sshll.u32 %s421_s19, 4  ;;  %s2476_s21 = int_to_ptr.vmem [resolvable:$true] %s1358_s21 }
  0x8f   : > { %1605 = vmatpush3.bf16.msra.mxu0 %v1811_v3  ;;  %vm2352_vm2 = vcmp.ne.s32.totalorder %v440_v5, 0  ;;  %v454_v19 = vand.u32 15, %v434_v10  ;;  %v447_v21 = vand.u32 15, %v433_v12  ;;  %v498_v29 = vsel %vm496_vm1, %v493_v16, %v494_v20  ;;  %1640 = vmatprep.subr.bf16.mxu1 %v1823_v34  ;;  %v1817_v43 = vld [vmem:[#allocation5 + $0x18] sm:$0xff]   ;;  %v1826_v44 = vld [vmem:[#allocation7 + $0x60] sm:$0xff]   ;;  %v1819_v49 = vld [vmem:[#allocation5 + $0x48] sm:$0xff]  }
  0x90   : > { %1606 = vmatprep.subr.bf16.mxu0 %v1812_v4  ;;  %v509_v26 = vsel %vm2352_vm2, %v500_v18, 0.0  ;;  %v519_v33 = vsel %vm517_vm3, %v514_v22, %v515_v23  ;;  %v435_v36 = vadd.s32 24, %v2329_v1  ;;  %v513_v37 = vrot.slane %v2333_v6, 1  ;;  %v1818_v45 = vld [vmem:[#allocation5 + $0x40] sm:$0xff]   ;;  %v1820_v52 = vld [vmem:[#allocation5 + $0x50] sm:$0xff]   ;;  %v1821_v54 = vld [vmem:[#allocation5 + $0x58] sm:$0xff]  }
  0x91   : > { %vm2374_vm4 = vcmp.ne.s32.totalorder %v454_v19, 0  ;;  %v534_v31 = vpack.c.bf16 %v499_v25, %v509_v26  ;;  %vm2380_vm5 = vcmp.ne.s32.totalorder %v447_v21, 15  ;;  %v497_v46 = vsel %vm496_vm1, %v494_v20, %v495_v13  ;;  %v1827_v60 = vld [vmem:[#allocation7 + $0x68] sm:$0xff]   ;;  %v1828_v61 = vld [vmem:[#allocation7 + $0x70] sm:$0xff]   ;;  %v1829_v62 = vld [vmem:[#allocation7 + $0x78] sm:$0xff]   ;;  %s2569_s23 = sld [smem:[#allocation18_spill]] }
  0x92   : > { %v511_v38 = vsel %vm2374_vm4, %v498_v29, 0.0  ;;  %v531_v40 = vsel %vm2380_vm5, %v519_v33, 0.0  ;;  %1641 = vmatpush3.bf16.msra.mxu1 %v1823_v34  ;;  %v520_v47 = vsel %vm517_vm3, %v513_v37, %v514_v22  ;;  %v516_v51 = vrot.slane %v2345_v11, 1  ;;  %v1830_v63 = vld [vmem:[#allocation7] sm:$0xff]   ;;  %v1844_v2 = vld [vmem:[#allocation8 + $0x8] sm:$0xff]   ;;  %v1846_v3 = vld [vmem:[#allocation8 + $0x10] sm:$0xff]  }
  0x93   : > { %1607 = vmatpush3.bf16.msra.mxu0 %v1812_v4  ;;  %1642 = vmatprep.subr.bf16.mxu1 %v1824_v41  ;;  %v535_v48 = vpack.c.bf16 %v497_v46, %v511_v38  ;;  %v712_v50 = vpack.c.bf16 %v531_v40, %v520_v47  ;;  %v461_v53 = vand.u32 15, %v435_v36  ;;  %v1842_v0 = vld [vmem:[#allocation8] sm:$0xff]   ;;  %v1848_v4 = vld [vmem:[#allocation8 + $0x18] sm:$0xff]   ;;  %v1831_v40 = vld [vmem:[#allocation7 + $0x8] sm:$0xff]   ;;  %s1345_s17 = scalar_lea.sflag [#allocation4], %s2309_s18  ;;  %s1964_s11 = scalar_lea.vmem %s2476_s21, 512 }
  0x94   : > { %1608 = vmatprep.subr.bf16.mxu0 %v1813_v15  ;;  %v521_v56 = vsel %vm517_vm3, %v516_v51, %v513_v37  ;;  %v518_v57 = vsel %vm517_vm3, %v515_v23, %v516_v51  ;;  %v1493_v5 = vld [vmem:[%s2529_s4] ss:$0 sm:$0xff]  ;;  %vm1511_vm8 = vmpackc.low %vm2048_vm7, %vm2352_vm2  ;;  %v1833_v14 = vld [vmem:[#allocation7 + $0x18] sm:$0xff]   ;;  %p1965_p10 = scmp.ne.s32.totalorder %s2476_s21, %s1964_s11  ;;  %s2049_s27 = smov [#allocation10]  }
  0x95   : > { %vm2404_vm6 = vcmp.ne.s32.totalorder %v461_v53, 15  ;;  %v1494_v7 = vld [vmem:[%s2530_s5] ss:$0 sm:$0xff]  ;;  %v1835_v1 = vld [vmem:[#allocation7 + $0x28] sm:$0xff]   ;;  %v1836_v51 = vld [vmem:[#allocation7 + $0x30] sm:$0xff]   ;;  %s1968_s24 = sshll.u32 %s2049_s27, 4  ;;  %s1969_s24 = int_to_ptr.vmem [resolvable:$false] %s1968_s24 }
  0x96   : > { %1643 = vmatpush3.bf16.msra.mxu1 %v1824_v41  ;;  %v533_v58 = vsel %vm2404_vm6, %v521_v56, 0.0  ;;  %v1838_v53 = vld [vmem:[#allocation7 + $0x80] sm:$0xff]   ;;  %vm1514_vm9 = vmpackc.low %vm2048_vm7, %vm2374_vm4  ;;  %v1840_v56 = vld [vmem:[#allocation7 + $0x90] sm:$0xff]   ;;  %p1966_p3 = pnand %p1965_p10, %p2261_p5  ;;  %s1970_s7 = scalar_lea.vmem %s1969_s24, 1024 }
  0x97   : > { %1609 = vmatpush3.bf16.msra.mxu0 %v1813_v15  ;;  %1644 = vmatprep.subr.bf16.mxu1 %v1825_v42  ;;  %v713_v59 = vpack.c.bf16 %v533_v58, %v518_v57  ;;  %vm1525_vm10 = vmpackc.low %vm2380_vm5, %vm2048_vm7  ;;  %v1841_v57 = vld [vmem:[#allocation7 + $0x98] sm:$0xff]   ;;  %v1843_v58 = vld [vmem:[#allocation7 + $0xa0] sm:$0xff]   ;;  %s2481_s26 = scalar_lea.hbm %s2569_s23, %s1547_s25  ;;  %p1971_p12 = scmp.lt.s32.totalorder %s2476_s21, %s1969_s24 }
  0x98   : > { %1614 = vmatprep.subr.bf16.mxu0 %v1814_v24  ;;  %v1845_v28 = vld [vmem:[#allocation7 + $0xa8] sm:$0xff]   ;;  %v1849_v32 = vld [vmem:[#allocation7 + $0xb8] sm:$0xff]   ;;  %vm1528_vm11 = vmpackc.low %vm2404_vm6, %vm2048_vm7  ;;  %p1967_p7 = pneg %p1966_p3  ;;  %p1972_p1 = scmp.lt.s32.totalorder %s1970_s7, %s1964_s11 }
  0x99   : > { %v1531_v55 = vld [vmem:[%s2531_s6] ss:$0 sm:$0xff] }
  0x9a   : > { %1611 = vmatmul.mubr.msk.bf16.vlgmr.msra.gmra.mrb[0].mxu0 %vm577_vm0, %v2372_v27  ;;  %1645 = vmatpush3.bf16.msra.mxu1 %v1825_v42  ;;  %p1973_p2 = por %p1972_p1, %p1971_p12 }
  0x9b   : > { %1615 = vmatpush3.bf16.msra.mxu0 %v1814_v24  ;;  %1622 = vmatprep.mubr.msk.bf16.mxu0 %vm577_vm0, %v534_v31 }
  0x9c   : > { %1616 = vmatprep.subr.bf16.mxu0 %v1815_v35  ;;  %1646 = vmatprep.subr.bf16.mxu1 %v1826_v44  ;;  %p1974_p4 = pnand %p1973_p2, %p1967_p7 }
  0x9e   : > { %1647 = vmatpush3.bf16.msra.mxu1 %v1826_v44 }
  0x9f   : > { %1617 = vmatpush3.bf16.msra.mxu0 %v1815_v35  ;;  %1648 = vmatprep.subr.bf16.mxu1 %v1827_v60 }
  0xa0   : > { %1618 = vmatprep.subr.bf16.mxu0 %v1816_v39 }
  0xa2   : > { %1649 = vmatpush3.bf16.msra.mxu1 %v1827_v60 }
  0xa3   : > { %1619 = vmatpush3.bf16.msra.mxu0 %v1816_v39  ;;  %1650 = vmatprep.subr.bf16.mxu1 %v1828_v61 }
  0xa4   : > { %1620 = vmatprep.subr.bf16.mxu0 %v1817_v43 }
  0xa6   : > { %1651 = vmatpush3.bf16.msra.mxu1 %v1828_v61 }
  0xa7   : > { %1621 = vmatpush3.bf16.msra.mxu0 %v1817_v43  ;;  %1652 = vmatprep.subr.bf16.mxu1 %v1829_v62 }
  0xa8   : > { %1626 = vmatprep.subr.bf16.mxu0 %v1818_v45 }
  0xaa   : > { %1623 = vmatmul.mubr.msk.bf16.vlgmr.msra.gmra.mrb[0].mxu0 %vm577_vm0, %v535_v48  ;;  %1653 = vmatpush3.bf16.msra.mxu1 %v1829_v62 }
  0xab   : > { %1627 = vmatpush3.bf16.msra.mxu0 %v1818_v45  ;;  %1634 = vmatprep.mubr.msk.bf16.mxu0 %vm577_vm0, %v712_v50  ;;  %v1834_v50 = vld [vmem:[#allocation7 + $0x20] sm:$0xff]  }
  0xac   : > { %1628 = vmatprep.subr.bf16.mxu0 %v1819_v49  ;;  %1658 = vmatprep.subr.bf16.mxu1 %v1830_v63 }
  0xaf   : > { %1629 = vmatpush3.bf16.msra.mxu0 %v1819_v49  ;;  %v1832_v49 = vld [vmem:[#allocation7 + $0x10] sm:$0xff]  }
  0xb0   : > { %1630 = vmatprep.subr.bf16.mxu0 %v1820_v52 }
  0xb3   : > { %1631 = vmatpush3.bf16.msra.mxu0 %v1820_v52  ;;  %v1837_v52 = vld [vmem:[#allocation7 + $0x38] sm:$0xff]  }
  0xb4   : > { %1632 = vmatprep.subr.bf16.mxu0 %v1821_v54 }
  0xb7   : > { %1633 = vmatpush3.bf16.msra.mxu0 %v1821_v54  ;;  %v1839_v54 = vld [vmem:[#allocation7 + $0x88] sm:$0xff]  }
  0xb8   : > { %1698 = vmatprep.subr.bf16.mxu0 %v1842_v0 }
  0xba   : > { %1635 = vmatmul.mubr.msk.bf16.vlgmr.msra.gmra.mrb[0].mxu0 %vm577_vm0, %v713_v59  ;;  %v1847_v59 = vld [vmem:[#allocation7 + $0xb0] sm:$0xff]  }
  0xbb   : > { %1706 = vmatprep.mubr.msk.bf16.mxu0 %vm577_vm0, %v2340_v8  ;;  %1699 = vmatpush3.bf16.msra.mxu0 %v1842_v0  ;;  %v1539_v0 = vld [vmem:[%s2533_s8] ss:$0 sm:$0xff] }
  0xbc   : > { %1700 = vmatprep.subr.bf16.mxu0 %v1844_v2 }
  0xbf   : > { %1701 = vmatpush3.bf16.msra.mxu0 %v1844_v2 }
  0xc0   : > { %1702 = vmatprep.subr.bf16.mxu0 %v1846_v3 }
  0xc3   : > { %1703 = vmatpush3.bf16.msra.mxu0 %v1846_v3  ;;  %v1540_v3 = vld [vmem:[%s2534_s9] ss:$0 sm:$0xff] }
  0xc4   : > { %1704 = vmatprep.subr.bf16.mxu0 %v1848_v4 }
  0xc7   : > { %1705 = vmatpush3.bf16.msra.mxu0 %v1848_v4 }
  0xca   : > { %1707 = vmatmul.mubr.msk.bf16.vlgmr.msra.gmra.mrb[4].mxu0 %vm577_vm0, %v2372_v27 }
 0x18d   : > { %v1636_v6 = vpop.f32.mrb[0].mxu0 }
 0x18e   : > { %v815_v8 = vmul.f32 %v1636_v6, %v1493_v5  ;;  %v787_v9 = vpop.f32.mrb[1].mxu0  ;;  %v1532_v6 = vld [vmem:[%s2568_s12] ss:$0 sm:$0xff] }
 0x18f   : > { %v813_v10 = vmul.f32 %v1493_v5, %v787_v9  ;;  %v1637_v11 = vpop.f32.mrb[2].mxu0 }
 0x190   : > { %v826_v12 = vadd.f32 %v1494_v7, %v815_v8  ;;  %v816_v13 = vmul.f32 %v1637_v11, %v1493_v5  ;;  %v790_v15 = vpop.f32.mrb[3].mxu0 }
 0x191   : > { %v824_v16 = vadd.f32 %v1494_v7, %v813_v10  ;;  %v814_v17 = vmul.f32 %v1493_v5, %v790_v15 }
 0x192   : > { %v830_v18 = vmax.f32 %v826_v12, 0.0  ;;  %v827_v19 = vadd.f32 %v1494_v7, %v816_v13 }
 0x193   : > { %v828_v20 = vmax.f32 %v824_v16, 0.0  ;;  %v825_v21 = vadd.f32 %v1494_v7, %v814_v17 }
 0x194   : > { %v831_v22 = vmax.f32 %v827_v19, 0.0  ;;  %v836_v23 = vrot.slane %v830_v18, 7  ;;  %v848_v27 = vrot.slane %v830_v18, 1 }
 0x195   : > { %v834_v24 = vrot.slane %v828_v20, 7  ;;  %v846_v25 = vrot.slane %v828_v20, 1  ;;  %v829_v26 = vmax.f32 %v825_v21, 0.0 }
 0x196   : > { %v837_v29 = vrot.slane %v831_v22, 7  ;;  %v849_v30 = vrot.slane %v831_v22, 1  ;;  %v833_v31 = vpack.c.bf16 %v831_v22, %v830_v18 }
 0x197   : > { %v835_v33 = vrot.slane %v829_v26, 7  ;;  %v847_v34 = vrot.slane %v829_v26, 1  ;;  %v832_v35 = vpack.c.bf16 %v829_v26, %v828_v20 }
 0x198   : > { %v838_v36 = vsel %vm496_vm1, %v836_v23, %v837_v29  ;;  %v2431_v37 = vsel %vm517_vm3, %v848_v27, %v849_v30  ;;  %v2435_v38 = vsel %vm517_vm3, %v849_v30, %v846_v25  ;;  %v841_v39 = vsel %vm496_vm1, %v837_v29, %v834_v24 }
 0x199   : > { %v839_v41 = vsel %vm496_vm1, %v835_v33, %v836_v23  ;;  %1654 = vmatprep.mubr.bf16.mxu1 %v832_v35  ;;  %v840_v42 = vsel %vm496_vm1, %v834_v24, %v835_v33  ;;  %v851_v43 = vsel %vm517_vm3, %v847_v34, %v848_v27  ;;  %v852_v44 = vsel %vm517_vm3, %v846_v25, %v847_v34 }
 0x19a   : > { %1655 = vmatmul.mubr.bf16.vlgmr.msra.gmra.mrb[0].mxu1 %v833_v31  ;;  %v1512_v45 = vpack.c.bf16 %v840_v42, %v841_v39  ;;  %v1515_v46 = vpack.c.bf16 %v838_v36, %v839_v41  ;;  %v1526_v47 = vpack.c.bf16 %v851_v43, %v852_v44  ;;  %v1529_v48 = vpack.c.bf16 %v2435_v38, %v2431_v37 }
 0x19b   : > { %1659 = vmatpush3.bf16.msra.mxu1 %v1830_v63 }
 0x19c   : > { %1674 = vmatprep.mubr.msk.bf16.mxu1 %vm1511_vm8, %v1512_v45  ;;  %1660 = vmatprep.subr.bf16.mxu1 %v1831_v40 }
 0x19d   : > { %v1708_v60 = vpop.f32.mrb[4].mxu0 }
 0x19e   : > { %v1295_v61 = vpop.f32.mrb[5].mxu0  ;;  %v1319_v2 = vmul.f32 %v1708_v60, %v1539_v0 }
 0x19f   : > { %1661 = vmatpush3.bf16.msra.mxu1 %v1831_v40  ;;  %v1709_v62 = vpop.f32.mrb[6].mxu0  ;;  %v1317_v4 = vmul.f32 %v1539_v0, %v1295_v61 }
 0x1a0   : > { %1662 = vmatprep.subr.bf16.mxu1 %v1832_v49  ;;  %v1298_v63 = vpop.f32.mrb[7].mxu0  ;;  %v1330_v7 = vadd.f32 %v1540_v3, %v1319_v2  ;;  %v1320_v8 = vmul.f32 %v1709_v62, %v1539_v0 }
 0x1a1   : > { %v1328_v11 = vadd.f32 %v1540_v3, %v1317_v4  ;;  %v1318_v12 = vmul.f32 %v1539_v0, %v1298_v63 }
 0x1a2   : > { %v1331_v21 = vadd.f32 %v1540_v3, %v1320_v8 }
 0x1a3   : > { %1663 = vmatpush3.bf16.msra.mxu1 %v1832_v49  ;;  %v1329_v24 = vadd.f32 %v1540_v3, %v1318_v12 }
 0x1a4   : > { %1664 = vmatprep.subr.bf16.mxu1 %v1833_v14 }
 0x1a7   : > { %1665 = vmatpush3.bf16.msra.mxu1 %v1833_v14 }
 0x1a8   : > { %1666 = vmatprep.subr.bf16.mxu1 %v1834_v50 }
 0x1ab   : > { %1667 = vmatpush3.bf16.msra.mxu1 %v1834_v50 }
 0x1ac   : > { %1668 = vmatprep.subr.bf16.mxu1 %v1835_v1 }
 0x1af   : > { %1669 = vmatpush3.bf16.msra.mxu1 %v1835_v1 }
 0x1b0   : > { %1670 = vmatprep.subr.bf16.mxu1 %v1836_v51 }
 0x1b3   : > { %1671 = vmatpush3.bf16.msra.mxu1 %v1836_v51 }
 0x1b4   : > { %1672 = vmatprep.subr.bf16.mxu1 %v1837_v52 }
 0x1b7   : > { %1673 = vmatpush3.bf16.msra.mxu1 %v1837_v52 }
 0x1b8   : > { %1678 = vmatprep.subr.bf16.mxu1 %v1838_v53 }
 0x1ba   : > { %1675 = vmatmul.mubr.msk.bf16.vlgmr.msra.gmra.mrb[0].mxu1 %vm1514_vm9, %v1515_v46 }
 0x1bb   : > { %1679 = vmatpush3.bf16.msra.mxu1 %v1838_v53  ;;  %1694 = vmatprep.mubr.msk.bf16.mxu1 %vm1525_vm10, %v1526_v47 }
 0x1bc   : > { %1680 = vmatprep.subr.bf16.mxu1 %v1839_v54 }
 0x1bf   : > { %1681 = vmatpush3.bf16.msra.mxu1 %v1839_v54 }
 0x1c0   : > { %1682 = vmatprep.subr.bf16.mxu1 %v1840_v56 }
 0x1c3   : > { %1683 = vmatpush3.bf16.msra.mxu1 %v1840_v56 }
 0x1c4   : > { %1684 = vmatprep.subr.bf16.mxu1 %v1841_v57 }
 0x1c7   : > { %1685 = vmatpush3.bf16.msra.mxu1 %v1841_v57 }
 0x1c8   : > { %1686 = vmatprep.subr.bf16.mxu1 %v1843_v58 }
 0x1cb   : > { %1687 = vmatpush3.bf16.msra.mxu1 %v1843_v58 }
 0x1cc   : > { %1688 = vmatprep.subr.bf16.mxu1 %v1845_v28 }
 0x1cf   : > { %1689 = vmatpush3.bf16.msra.mxu1 %v1845_v28 }
 0x1d0   : > { %1690 = vmatprep.subr.bf16.mxu1 %v1847_v59 }
 0x1d3   : > { %1691 = vmatpush3.bf16.msra.mxu1 %v1847_v59 }
 0x1d4   : > { %1692 = vmatprep.subr.bf16.mxu1 %v1849_v32 }
 0x1d7   : > { %1693 = vmatpush3.bf16.msra.mxu1 %v1849_v32 }
 0x1da   : > { %1695 = vmatmul.mubr.msk.bf16.vlgmr.msra.gmra.mrb[0].mxu1 %vm1528_vm11, %v1529_v48 }
 0x2ad   : > { %v1696_v5 = vpop.f32.mrb[0].mxu1 }
 0x2ae   : > { %v1216_v9 = vmul.f32 %v1696_v5, %v1531_v55  ;;  %v1188_v10 = vpop.f32.mrb[1].mxu1 }
 0x2af   : > { %v1214_v13 = vmul.f32 %v1531_v55, %v1188_v10  ;;  %v1697_v15 = vpop.f32.mrb[2].mxu1 }
 0x2b0   : > { %v1227_v16 = vadd.f32 %v1532_v6, %v1216_v9  ;;  %v1217_v17 = vmul.f32 %v1697_v15, %v1531_v55  ;;  %v1191_v18 = vpop.f32.mrb[3].mxu1 }
 0x2b1   : > { %v1225_v19 = vadd.f32 %v1532_v6, %v1214_v13  ;;  %v1215_v20 = vmul.f32 %v1531_v55, %v1191_v18 }
 0x2b2   : > { %v1334_v22 = vadd.f32 %v1330_v7, %v1227_v16  ;;  %v1228_v23 = vadd.f32 %v1532_v6, %v1217_v17 }
 0x2b3   : > { %v1332_v25 = vadd.f32 %v1328_v11, %v1225_v19  ;;  %v1226_v26 = vadd.f32 %v1532_v6, %v1215_v20 }
 0x2b4   : > { %v1338_v27 = vmax.f32 %v1334_v22, 0.0  ;;  %v1335_v29 = vadd.f32 %v1331_v21, %v1228_v23 }
 0x2b5   : > { %v1336_v30 = vmax.f32 %v1332_v25, 0.0  ;;  %v1333_v31 = vadd.f32 %v1329_v24, %v1226_v26 }
 0x2b6   : > { %1342 = vst [vmem:[%s421_s19 + $0x10] sm:$0xff] %v1338_v27  ;;  %v1339_v33 = vmax.f32 %v1335_v29, 0.0 }
 0x2b7   : > { %1340 = vst [vmem:[%s421_s19] sm:$0xff] %v1336_v30  ;;  %v1337_v34 = vmax.f32 %v1333_v31, 0.0 }
 0x2b8   : > { %1343 = vst [vmem:[%s421_s19 + $0x18] sm:$0xff] %v1339_v33 }
 0x2b9   : > { %1341 = vst [vmem:[%s421_s19 + $0x8] sm:$0xff] %v1337_v34 }
 0x2ba   : > { %1977 = shalt.err (!%p1974_p4)
}
 0x2bb   : > { %s1978_s10 = scalar_lea.hbm %s2481_s26, 512  ;;  %s1982_s19 = scalar_lea.hbm %s2569_s23, 1024 }
 0x2bc   : > { %p1979_p9 = scmp.ne.s32.totalorder %s2481_s26, %s1978_s10  ;;  %p1983_p8 = scmp.lt.u32.totalorder %s2481_s26, %s2569_s23 }
 0x2bd   : > { %p1984_p13 = scmp.lt.u32.totalorder %s1982_s19, %s1978_s10  ;;  %p1986_p10 = scmp.lt.u32.totalorder %s1978_s10, %s2481_s26 }
 0x2be   : > { %p1980_p0 = pnand %p1979_p9, %p2261_p5 }
 0x2bf   : > { %p1985_p6 = por %p1984_p13, %p1983_p8 }
 0x2c0   : > { %p1981_p11 = pneg %p1980_p0 }
 0x2c1   : > { %p1987_p3 = por %p1986_p10, %p1985_p6 }
 0x2c3   : > { %p1988_p7 = pnand %p1987_p3, %p1981_p11 }
 0x2c5   : > { %1991 = shalt.err (!%p1988_p7)
}
 0x2c6   : > { %s2050_s29 = smov 128   ;;  %s2051_s11 = smov 8  }
 0x2c7   : > { %1740 = dma.vmem_to_hbm [thread:$0]  (%p2261_p5), %s2476_s21, 512, %s2481_s26, %s1345_s17, %s2050_s29, %s2050_s29, %s2051_s11  }
 0x2c8 PF: > { %s2570_s27 = sld [smem:[#allocation15_spill]]  ;;  %s2571_s24 = sld [smem:[#allocation16_spill]] }
 0x2c9   : > { %p2573_p1 = scmp.ge.s32.totalorder %s2038_s16, 2 }
 0x2ce   : > { %s1373_s7 = sand.u32 1, %s2570_s27   ;;  %p2572_p12 = scmp.ne.s32.totalorder %s2571_s24, 0 }
 0x2cf   : > { %s1374_s10 = scalar_lea.sflag [#allocation4], %s1373_s7 }
 0x2d0   : > { %p1757_p2 = pnand %p2573_p1, %p2572_p12 }
 0x2d2   : > { %2021 = dma.done.wait (!%p1757_p2), %s1374_s10, 512  }
 0x2d3   : > { %2023 = vsyncadd (!%p1757_p2), %s1374_s10, 4294966784  ;;  %s2574_s30 = smov %s2257_s13  ;;  %p25_p4 = scmp.ge.s32.totalorder %s2247_s22, 4  }
 0x2d4   : > { %s2575_s13 = smov %s2030_s14  ;;  %s2576_s14 = smov %s2034_s15 }
 0x2d5   : > { %s2577_s15 = smov %s2574_s30  ;;  %s2578_s16 = smov %s2247_s22 }
 0x2d6   :  { %27 = sbr.rel (!%p25_p4) target bundleno = 10 (0xa), region = 121 }
 0x2dd   :  { %1379 = vsyncpa [#allocation3], 1 }
 0x2de   :  { %1381 = vsyncpa [#allocation3 + $0x1], 1 }
 0x2df   :  { %1382 = vsyncpa [#allocation6], 1 }
 0x2e0   :  { %1383 = vsyncpa [#allocation9], 1 }
 0x2e1   :  { %1384 = vsyncpa [#allocation4], 1 }
 0x2e2   :  { %1386 = vsyncpa [#allocation4 + $0x1], 1 }

</bundles_post_ra>
